<compile_context>
chip_gen: v7x
topology: tpu7x:2x2x1
jax: 0.10.0
libtpu: 0.0.40
codegen_flags: <defaults>
</compile_context>

<pallas_src>
import functools

import jax
import jax.numpy as jnp
import numpy as np
from jax.experimental import pallas as pl
from jax.experimental.pallas import tpu as pltpu

EPSILON = float(np.finfo(np.float32).eps)  # audiozen's EPSILON


def _group_norm(y, gamma, beta, eps):
    """GroupNorm(num_groups=1) over the whole (H, T) sample.

    Two-pass f32 statistics (mean, then centered second moment) for numerical
    robustness.  Lane-reductions with keepdims run first (cheap [*,128] lane
    tree on the XLU), the leftover (H,1) sublane reduce is tiny, and the
    affine is fused into a single scale/shift pass.
    """
    h, t = y.shape
    inv_n = 1.0 / float(h * t)
    mu = jnp.sum(jnp.sum(y, axis=1, keepdims=True)) * inv_n
    d = y - mu
    var = jnp.sum(jnp.sum(d * d, axis=1, keepdims=True)) * inv_n
    inv = jax.lax.rsqrt(var + eps)          # EUP slot, essentially free
    return d * (gamma * inv) + beta         # one fused [H,T] scale/shift pass


def _tcn_kernel(x_ref, w1_ref, b1_ref, a1_ref, g1_ref, be1_ref,
                dw_ref, db_ref, a2_ref, g2_ref, be2_ref,
                w3_ref, b3_ref, out_ref,
                *, kernel_size, dilation, padding, use_skip, eps):
    x = x_ref[...].astype(jnp.float32)                                   # [C_in, T]

    # --- conv1x1: pointwise conv == MXU matmul.  Weights arrive pre-cast
    #     (bf16 by default); cast the activation to match, accumulate in f32.
    y = jnp.dot(w1_ref[...], x.astype(w1_ref.dtype),
                preferred_element_type=jnp.float32) + b1_ref[...]        # [H, T]

    # --- PReLU1 (single shared alpha, PyTorch default num_parameters=1)
    a1 = a1_ref[0, 0]
    y = jnp.where(y >= 0.0, y, a1 * y)

    # --- GroupNorm(1, H)
    y = _group_norm(y, g1_ref[...], be1_ref[...], eps)

    # --- depthwise dilated conv (groups == hidden_channel), fully in vregs.
    # out[:, t] = db + sum_k dw[:, k] * y[:, t + k*dilation - padding]  (zero pad)
    # Each tap is an XLU lane-roll of y plus a boundary mask; the bias is
    # folded into the first tap (no separate [H,T] add pass).  For causal mode
    # (padding = d*(K-1)) this already yields exactly the first T frames,
    # i.e. the PyTorch `y[:, :, :-padding]`.
    H, T = y.shape
    lane = jax.lax.broadcasted_iota(jnp.int32, (1, T), 1)     # hoisted out of loop
    acc = None
    for k in range(kernel_size):                              # static, unrolled
        s = k * dilation - padding                            # signed source offset
        if s == 0:
            tap = y
        else:
            tap = pltpu.roll(y, shift=(-s) % T, axis=1)       # tap[t] = y[(t+s) mod T]
            if s < 0:
                tap = jnp.where(lane >= -s, tap, 0.0)         # left halo -> 0
            else:
                tap = jnp.where(lane < T - s, tap, 0.0)       # right halo -> 0
        if acc is None:
            acc = dw_ref[k] * tap + db_ref[...]               # (H,1)*(H,T) + (H,1)
        else:
            acc = acc + dw_ref[k] * tap
    y = acc

    # --- PReLU2
    a2 = a2_ref[0, 0]
    y = jnp.where(y >= 0.0, y, a2 * y)

    # --- GroupNorm2
    y = _group_norm(y, g2_ref[...], be2_ref[...], eps)

    # --- sconv (1x1): [C_out, H] @ [H, T] -> [C_out, T], bf16 MXU / f32 acc.
    out = jnp.dot(w3_ref[...], y.astype(w3_ref.dtype),
                  preferred_element_type=jnp.float32) + b3_ref[...]
    if use_skip:
        out = out + x
    out_ref[...] = out.astype(out_ref.dtype)


def tcn_block(x, params, *, kernel_size=3, dilation=1, causal=False,
              use_skip_connection=True, mxu_dtype=jnp.bfloat16):
    """TCNBlock forward.  x: [C, T] (unbatched, like the PyTorch docstring)
    or [B, C, T] (batch mapped onto a 'parallel' Pallas grid axis)."""
    squeeze_batch = (x.ndim == 2)
    if squeeze_batch:
        x = x[None]
    b, c_in, t = x.shape
    hidden = params["w1"].shape[0]
    c_out = params["w3"].shape[0]
    if use_skip_connection:
        assert c_out == c_in, "skip connection requires out_channels == in_channels"
    if not causal and (dilation * (kernel_size - 1)) % 2 != 0:
        # PyTorch Conv1d with padding = floor(d*(K-1)/2) would emit T-1 frames here.
        raise NotImplementedError("non-causal mode with odd dilation*(kernel_size-1)")
    padding = (dilation * (kernel_size - 1)) if causal else (dilation * (kernel_size - 1) // 2)

    # 1x1-conv weights pre-cast to the MXU operand dtype (bf16 by default).
    w1 = params["w1"].astype(mxu_dtype)
    w3 = params["w3"].astype(mxu_dtype)
    # Depthwise weights as (K, H, 1): one clean sublane load per tap in-kernel.
    dw_t = jnp.transpose(params["dw"])[:, :, None]

    kern = functools.partial(
        _tcn_kernel,
        kernel_size=kernel_size, dilation=dilation, padding=padding,
        use_skip=use_skip_connection, eps=EPSILON)

    smem = pltpu.MemorySpace.SMEM
    # Parameters use constant index maps -> fetched once, resident across grid.
    in_specs = [
        pl.BlockSpec((None, c_in, t), lambda i: (i, 0, 0)),            # x (per sample)
        pl.BlockSpec((hidden, c_in), lambda i: (0, 0)),                # w1 (mxu dtype)
        pl.BlockSpec((hidden, 1), lambda i: (0, 0)),                   # b1
        pl.BlockSpec((1, 1), lambda i: (0, 0), memory_space=smem),     # alpha1
        pl.BlockSpec((hidden, 1), lambda i: (0, 0)),                   # gamma1
        pl.BlockSpec((hidden, 1), lambda i: (0, 0)),                   # beta1
        pl.BlockSpec((kernel_size, hidden, 1), lambda i: (0, 0, 0)),   # dw (K,H,1)
        pl.BlockSpec((hidden, 1), lambda i: (0, 0)),                   # db
        pl.BlockSpec((1, 1), lambda i: (0, 0), memory_space=smem),     # alpha2
        pl.BlockSpec((hidden, 1), lambda i: (0, 0)),                   # gamma2
        pl.BlockSpec((hidden, 1), lambda i: (0, 0)),                   # beta2
        pl.BlockSpec((c_out, hidden), lambda i: (0, 0)),               # w3 (mxu dtype)
        pl.BlockSpec((c_out, 1), lambda i: (0, 0)),                    # b3
    ]
    out_specs = pl.BlockSpec((None, c_out, t), lambda i: (i, 0, 0))

    # Generation-aware scoped-VMEM limit: ~3/4 of physical capacity
    # (~96 MiB on v5e/v6e's 128 MiB, ~48 MiB on v7x's 64 MiB) so the
    # single-shot T ceiling isn't capped at the 16/32 MiB scoped defaults.
    try:
        vmem_cap = int(pltpu.get_tpu_info().vmem_capacity_bytes)
    except Exception:  # conservative fallback, valid on every generation
        vmem_cap = 64 * 1024 * 1024
    vmem_bytes = (vmem_cap * 3) // 4

    out = pl.pallas_call(
        kern,
        grid=(b,),
        out_shape=jax.ShapeDtypeStruct((b, c_out, t), x.dtype),
        in_specs=in_specs,
        out_specs=out_specs,
        compiler_params=pltpu.CompilerParams(
            dimension_semantics=("parallel",),   # megacore-shard batch on v7x
            vmem_limit_bytes=vmem_bytes),
    )(x, w1, params["b1"], params["alpha1"], params["gamma1"], params["beta1"],
      dw_t, params["db"], params["alpha2"], params["gamma2"], params["beta2"],
      w3, params["b3"])
    return out[0] if squeeze_batch else out


def init_params(key, in_channels, hidden, out_channels, kernel_size):
    ks = jax.random.split(key, 6)

    def unif(k, shape, scale):
        return jax.random.uniform(k, shape, jnp.float32, -1.0, 1.0) * scale

    return {
        "w1": unif(ks[0], (hidden, in_channels), 1.0 / np.sqrt(in_channels)),
        "b1": unif(ks[1], (hidden, 1), 1.0 / np.sqrt(in_channels)),
        "alpha1": jnp.full((1, 1), 0.25, jnp.float32),           # PReLU default
        "gamma1": jnp.ones((hidden, 1), jnp.float32),            # GroupNorm affine
        "beta1": jnp.zeros((hidden, 1), jnp.float32),
        "dw": unif(ks[2], (hidden, kernel_size), 1.0 / np.sqrt(kernel_size)),
        "db": unif(ks[3], (hidden, 1), 1.0 / np.sqrt(kernel_size)),
        "alpha2": jnp.full((1, 1), 0.25, jnp.float32),
        "gamma2": jnp.ones((hidden, 1), jnp.float32),
        "beta2": jnp.zeros((hidden, 1), jnp.float32),
        "w3": unif(ks[4], (out_channels, hidden), 1.0 / np.sqrt(hidden)),
        "b3": unif(ks[5], (out_channels, 1), 1.0 / np.sqrt(hidden)),
    }


def tcn_ref(x, p, *, kernel_size, dilation, causal, use_skip,
            matmul_dtype=jnp.float32):
    """Pure-JAX reference of the PyTorch forward (per sample, x: [C, T]).

    `matmul_dtype` mirrors the kernel's MXU operand dtype so the kernel can be
    checked tightly against a like-precision reference."""
    padding = (dilation * (kernel_size - 1)) if causal else (dilation * (kernel_size - 1) // 2)
    t = x.shape[1]
    y = jnp.dot(p["w1"].astype(matmul_dtype), x.astype(matmul_dtype),
                preferred_element_type=jnp.float32) + p["b1"]
    y = jnp.where(y >= 0, y, p["alpha1"][0, 0] * y)
    y = (y - jnp.mean(y)) / jnp.sqrt(jnp.var(y) + EPSILON) * p["gamma1"] + p["beta1"]
    yp = jnp.pad(y, ((0, 0), (padding, padding)))
    acc = sum(p["dw"][:, k:k + 1] * yp[:, k * dilation:k * dilation + t]
              for k in range(kernel_size))
    y = acc + p["db"]
    y = jnp.where(y >= 0, y, p["alpha2"][0, 0] * y)
    y = (y - jnp.mean(y)) / jnp.sqrt(jnp.var(y) + EPSILON) * p["gamma2"] + p["beta2"]
    out = jnp.dot(p["w3"].astype(matmul_dtype), y.astype(matmul_dtype),
                  preferred_element_type=jnp.float32) + p["b3"]
    return x + out if use_skip else out


if __name__ == "__main__":
    # small shapes consistent with the module: per-sample x is [channels, T]
    B, C_IN, HIDDEN, C_OUT = 2, 8, 32, 8    # C_OUT == C_IN required by the skip add
    T = 256
    K = 3

    key = jax.random.PRNGKey(0)
    kx, kp = jax.random.split(key)
    x = jax.random.normal(kx, (B, C_IN, T), jnp.float32)
    params = init_params(kp, C_IN, HIDDEN, C_OUT, K)

    # exercise both the non-causal and causal paths of the roll-based depthwise conv
    for dil, causal in ((2, False), (2, True)):
        out = jax.block_until_ready(
            tcn_block(x, params, kernel_size=K, dilation=dil, causal=causal,
                      use_skip_connection=True))
        for bi in range(B):
            # tight check vs a like-precision (bf16-MXU / f32-accumulate) reference
            ref_same = tcn_ref(x[bi], params, kernel_size=K, dilation=dil,
                               causal=causal, use_skip=True,
                               matmul_dtype=jnp.bfloat16)
            np.testing.assert_allclose(np.asarray(out[bi]), np.asarray(ref_same),
                                       rtol=2e-3, atol=2e-3)
            # coarse fidelity check vs the exact-f32 module semantics; the gap is
            # bounded by bf16 quantization of the MXU operands.
            ref_f32 = tcn_ref(x[bi], params, kernel_size=K, dilation=dil,
                              causal=causal, use_skip=True,
                              matmul_dtype=jnp.float32)
            np.testing.assert_allclose(np.asarray(out[bi]), np.asarray(ref_f32),
                                       rtol=1e-1, atol=1e-1)

    # full-f32 MXU path (exact module semantics) + the unbatched [C, T] entry point
    out_f32 = jax.block_until_ready(
        tcn_block(x[0], params, kernel_size=K, dilation=1, causal=True,
                  use_skip_connection=True, mxu_dtype=jnp.float32))
    ref_f32 = tcn_ref(x[0], params, kernel_size=K, dilation=1, causal=True,
                      use_skip=True, matmul_dtype=jnp.float32)
    np.testing.assert_allclose(np.asarray(out_f32), np.asarray(ref_f32),
                               rtol=1e-3, atol=1e-3)

    print("KERNEL_OK")
</pallas_src>

<mosaic_0001>
module attributes {stable_mosaic.version = 11 : i64} {
  func.func @_tcn_kernel(%arg0: i32, %arg1: memref<1x8x256xf32, #tpu.memory_space<vmem>>, %arg2: memref<32x8xbf16, #tpu.memory_space<vmem>>, %arg3: memref<32x1xf32, #tpu.memory_space<vmem>>, %arg4: memref<1x1xf32, #tpu.memory_space<smem>>, %arg5: memref<32x1xf32, #tpu.memory_space<vmem>>, %arg6: memref<32x1xf32, #tpu.memory_space<vmem>>, %arg7: memref<3x32x1xf32, #tpu.memory_space<vmem>>, %arg8: memref<32x1xf32, #tpu.memory_space<vmem>>, %arg9: memref<1x1xf32, #tpu.memory_space<smem>>, %arg10: memref<32x1xf32, #tpu.memory_space<vmem>>, %arg11: memref<32x1xf32, #tpu.memory_space<vmem>>, %arg12: memref<8x32xbf16, #tpu.memory_space<vmem>>, %arg13: memref<8x1xf32, #tpu.memory_space<vmem>>, %arg14: memref<1x8x256xf32, #tpu.memory_space<vmem>>) attributes {dimension_semantics = [#tpu.dimension_semantics<parallel>], iteration_bounds = array<i64: 2>, scalar_prefetch = 0 : i64, scratch_operands = 0 : i64, tpu.core_type = #tpu.core_type<tc>, window_params = [{transform_indices = @transform_0, window_bounds = array<i64: 1, 8, 256>}, {pipeline_mode = #tpu.pipeline_mode<synchronous>, transform_indices = @transform_1, window_bounds = array<i64: 32, 8>}, {pipeline_mode = #tpu.pipeline_mode<synchronous>, transform_indices = @transform_2, window_bounds = array<i64: 32, 1>}, {transform_indices = @transform_3, window_bounds = array<i64: 1, 1>}, {pipeline_mode = #tpu.pipeline_mode<synchronous>, transform_indices = @transform_4, window_bounds = array<i64: 32, 1>}, {pipeline_mode = #tpu.pipeline_mode<synchronous>, transform_indices = @transform_5, window_bounds = array<i64: 32, 1>}, {pipeline_mode = #tpu.pipeline_mode<synchronous>, transform_indices = @transform_6, window_bounds = array<i64: 3, 32, 1>}, {pipeline_mode = #tpu.pipeline_mode<synchronous>, transform_indices = @transform_7, window_bounds = array<i64: 32, 1>}, {transform_indices = @transform_8, window_bounds = array<i64: 1, 1>}, {pipeline_mode = #tpu.pipeline_mode<synchronous>, transform_indices = @transform_9, window_bounds = array<i64: 32, 1>}, {pipeline_mode = #tpu.pipeline_mode<synchronous>, transform_indices = @transform_10, window_bounds = array<i64: 32, 1>}, {pipeline_mode = #tpu.pipeline_mode<synchronous>, transform_indices = @transform_11, window_bounds = array<i64: 8, 32>}, {pipeline_mode = #tpu.pipeline_mode<synchronous>, transform_indices = @transform_12, window_bounds = array<i64: 8, 1>}, {transform_indices = @transform_13, window_bounds = array<i64: 1, 8, 256>}]} {
    %c0 = arith.constant 0 : index
    %c0_0 = arith.constant 0 : index
    %c0_1 = arith.constant 0 : index
    %0 = vector.load %arg1[%c0, %c0_0, %c0_1] : memref<1x8x256xf32, #tpu.memory_space<vmem>>, vector<1x8x256xf32>
    %1 = vector.shape_cast %0 : vector<1x8x256xf32> to vector<8x256xf32>
    %c0_2 = arith.constant 0 : index
    %c0_3 = arith.constant 0 : index
    %2 = vector.load %arg2[%c0_2, %c0_3] : memref<32x8xbf16, #tpu.memory_space<vmem>>, vector<32x8xbf16>
    %3 = arith.truncf %1 : vector<8x256xf32> to vector<8x256xbf16>
    %cst = arith.constant dense<0.000000e+00> : vector<32x256xf32>
    %4 = tpu.matmul %2, %3, %cst {dimension_numbers = #tpu.dot_dimension_numbers<[1], [0], [0], [1], [0, 0, 1, 1], [], []>} : vector<32x8xbf16>, vector<8x256xbf16>, vector<32x256xf32> -> vector<32x256xf32>
    %c0_4 = arith.constant 0 : index
    %c0_5 = arith.constant 0 : index
    %5 = vector.load %arg3[%c0_4, %c0_5] : memref<32x1xf32, #tpu.memory_space<vmem>>, vector<32x1xf32>
    %6 = vector.broadcast %5 : vector<32x1xf32> to vector<32x256xf32>
    %7 = arith.addf %4, %6 : vector<32x256xf32>
    %c0_6 = arith.constant 0 : index
    %c0_7 = arith.constant 0 : index
    %8 = memref.load %arg4[%c0_6, %c0_7] : memref<1x1xf32, #tpu.memory_space<smem>>
    %cst_8 = arith.constant 0.000000e+00 : f32
    %9 = vector.broadcast %cst_8 : f32 to vector<32x256xf32>
    %10 = arith.cmpf oge, %7, %9 : vector<32x256xf32>
    %11 = vector.broadcast %8 : f32 to vector<32x256xf32>
    %12 = arith.mulf %11, %7 : vector<32x256xf32>
    %13 = arith.select %10, %7, %12 : vector<32x256xi1>, vector<32x256xf32>
    %c0_9 = arith.constant 0 : index
    %c0_10 = arith.constant 0 : index
    %14 = vector.load %arg5[%c0_9, %c0_10] : memref<32x1xf32, #tpu.memory_space<vmem>>, vector<32x1xf32>
    %c0_11 = arith.constant 0 : index
    %c0_12 = arith.constant 0 : index
    %15 = vector.load %arg6[%c0_11, %c0_12] : memref<32x1xf32, #tpu.memory_space<vmem>>, vector<32x1xf32>
    %cst_13 = arith.constant dense<0.000000e+00> : vector<32xf32>
    %16 = vector.multi_reduction <add>, %13, %cst_13 [1] : vector<32x256xf32> to vector<32xf32>
    %17 = vector.shape_cast %16 : vector<32xf32> to vector<32x1xf32>
    %18 = vector.shape_cast %17 : vector<32x1xf32> to vector<1x32x1xf32>
    %cst_14 = arith.constant dense<0.000000e+00> : vector<1xf32>
    %19 = vector.multi_reduction <add>, %18, %cst_14 [1, 2] : vector<1x32x1xf32> to vector<1xf32>
    %20 = vector.shape_cast %19 : vector<1xf32> to vector<1x1x1xf32>
    %21 = vector.extract %20[0, 0, 0] : f32 from vector<1x1x1xf32>
    %cst_15 = arith.constant 1.22070313E-4 : f32
    %22 = arith.mulf %21, %cst_15 : f32
    %23 = vector.broadcast %22 : f32 to vector<32x256xf32>
    %24 = arith.subf %13, %23 : vector<32x256xf32>
    %25 = arith.mulf %24, %24 : vector<32x256xf32>
    %cst_16 = arith.constant dense<0.000000e+00> : vector<32xf32>
    %26 = vector.multi_reduction <add>, %25, %cst_16 [1] : vector<32x256xf32> to vector<32xf32>
    %27 = vector.shape_cast %26 : vector<32xf32> to vector<32x1xf32>
    %28 = vector.shape_cast %27 : vector<32x1xf32> to vector<1x32x1xf32>
    %cst_17 = arith.constant dense<0.000000e+00> : vector<1xf32>
    %29 = vector.multi_reduction <add>, %28, %cst_17 [1, 2] : vector<1x32x1xf32> to vector<1xf32>
    %30 = vector.shape_cast %29 : vector<1xf32> to vector<1x1x1xf32>
    %31 = vector.extract %30[0, 0, 0] : f32 from vector<1x1x1xf32>
    %cst_18 = arith.constant 1.22070313E-4 : f32
    %32 = arith.mulf %31, %cst_18 : f32
    %cst_19 = arith.constant 1.1920929E-7 : f32
    %33 = arith.addf %32, %cst_19 : f32
    %34 = math.rsqrt %33 : f32
    %35 = vector.broadcast %34 : f32 to vector<32x1xf32>
    %36 = arith.mulf %14, %35 : vector<32x1xf32>
    %37 = vector.broadcast %36 : vector<32x1xf32> to vector<32x256xf32>
    %38 = arith.mulf %24, %37 : vector<32x256xf32>
    %39 = vector.broadcast %15 : vector<32x1xf32> to vector<32x256xf32>
    %40 = arith.addf %38, %39 : vector<32x256xf32>
    %41 = tpu.iota {dimensions = array<i32: 1>} : vector<1x256xi32>
    %c2_i32 = arith.constant 2 : i32
    %42 = tpu.dynamic_rotate %40 by %c2_i32 dim 1 : vector<32x256xf32>, i32 -> vector<32x256xf32>
    %c2_i32_20 = arith.constant 2 : i32
    %43 = vector.broadcast %c2_i32_20 : i32 to vector<1x256xi32>
    %44 = arith.cmpi sge, %41, %43 : vector<1x256xi32>
    %cst_21 = arith.constant 0.000000e+00 : f32
    %45 = vector.shape_cast %44 : vector<1x256xi1> to vector<1x256xi1>
    %46 = vector.broadcast %45 : vector<1x256xi1> to vector<32x256xi1>
    %47 = vector.broadcast %cst_21 : f32 to vector<32x256xf32>
    %48 = arith.select %46, %42, %47 : vector<32x256xi1>, vector<32x256xf32>
    %c0_22 = arith.constant 0 : index
    %c0_23 = arith.constant 0 : index
    %c0_24 = arith.constant 0 : index
    %49 = vector.load %arg7[%c0_22, %c0_23, %c0_24] : memref<3x32x1xf32, #tpu.memory_space<vmem>>, vector<1x32x1xf32>
    %50 = vector.shape_cast %49 : vector<1x32x1xf32> to vector<32x1xf32>
    %51 = vector.broadcast %50 : vector<32x1xf32> to vector<32x256xf32>
    %52 = arith.mulf %51, %48 : vector<32x256xf32>
    %c0_25 = arith.constant 0 : index
    %c0_26 = arith.constant 0 : index
    %53 = vector.load %arg8[%c0_25, %c0_26] : memref<32x1xf32, #tpu.memory_space<vmem>>, vector<32x1xf32>
    %54 = vector.broadcast %53 : vector<32x1xf32> to vector<32x256xf32>
    %55 = arith.addf %52, %54 : vector<32x256xf32>
    %c1 = arith.constant 1 : index
    %c0_27 = arith.constant 0 : index
    %c0_28 = arith.constant 0 : index
    %56 = vector.load %arg7[%c1, %c0_27, %c0_28] : memref<3x32x1xf32, #tpu.memory_space<vmem>>, vector<1x32x1xf32>
    %57 = vector.shape_cast %56 : vector<1x32x1xf32> to vector<32x1xf32>
    %58 = vector.broadcast %57 : vector<32x1xf32> to vector<32x256xf32>
    %59 = arith.mulf %58, %40 : vector<32x256xf32>
    %60 = arith.addf %55, %59 : vector<32x256xf32>
    %c254_i32 = arith.constant 254 : i32
    %61 = tpu.dynamic_rotate %40 by %c254_i32 dim 1 : vector<32x256xf32>, i32 -> vector<32x256xf32>
    %c254_i32_29 = arith.constant 254 : i32
    %62 = vector.broadcast %c254_i32_29 : i32 to vector<1x256xi32>
    %63 = arith.cmpi slt, %41, %62 : vector<1x256xi32>
    %cst_30 = arith.constant 0.000000e+00 : f32
    %64 = vector.shape_cast %63 : vector<1x256xi1> to vector<1x256xi1>
    %65 = vector.broadcast %64 : vector<1x256xi1> to vector<32x256xi1>
    %66 = vector.broadcast %cst_30 : f32 to vector<32x256xf32>
    %67 = arith.select %65, %61, %66 : vector<32x256xi1>, vector<32x256xf32>
    %c2 = arith.constant 2 : index
    %c0_31 = arith.constant 0 : index
    %c0_32 = arith.constant 0 : index
    %68 = vector.load %arg7[%c2, %c0_31, %c0_32] : memref<3x32x1xf32, #tpu.memory_space<vmem>>, vector<1x32x1xf32>
    %69 = vector.shape_cast %68 : vector<1x32x1xf32> to vector<32x1xf32>
    %70 = vector.broadcast %69 : vector<32x1xf32> to vector<32x256xf32>
    %71 = arith.mulf %70, %67 : vector<32x256xf32>
    %72 = arith.addf %60, %71 : vector<32x256xf32>
    %c0_33 = arith.constant 0 : index
    %c0_34 = arith.constant 0 : index
    %73 = memref.load %arg9[%c0_33, %c0_34] : memref<1x1xf32, #tpu.memory_space<smem>>
    %cst_35 = arith.constant 0.000000e+00 : f32
    %74 = vector.broadcast %cst_35 : f32 to vector<32x256xf32>
    %75 = arith.cmpf oge, %72, %74 : vector<32x256xf32>
    %76 = vector.broadcast %73 : f32 to vector<32x256xf32>
    %77 = arith.mulf %76, %72 : vector<32x256xf32>
    %78 = arith.select %75, %72, %77 : vector<32x256xi1>, vector<32x256xf32>
    %c0_36 = arith.constant 0 : index
    %c0_37 = arith.constant 0 : index
    %79 = vector.load %arg10[%c0_36, %c0_37] : memref<32x1xf32, #tpu.memory_space<vmem>>, vector<32x1xf32>
    %c0_38 = arith.constant 0 : index
    %c0_39 = arith.constant 0 : index
    %80 = vector.load %arg11[%c0_38, %c0_39] : memref<32x1xf32, #tpu.memory_space<vmem>>, vector<32x1xf32>
    %cst_40 = arith.constant dense<0.000000e+00> : vector<32xf32>
    %81 = vector.multi_reduction <add>, %78, %cst_40 [1] : vector<32x256xf32> to vector<32xf32>
    %82 = vector.shape_cast %81 : vector<32xf32> to vector<32x1xf32>
    %83 = vector.shape_cast %82 : vector<32x1xf32> to vector<1x32x1xf32>
    %cst_41 = arith.constant dense<0.000000e+00> : vector<1xf32>
    %84 = vector.multi_reduction <add>, %83, %cst_41 [1, 2] : vector<1x32x1xf32> to vector<1xf32>
    %85 = vector.shape_cast %84 : vector<1xf32> to vector<1x1x1xf32>
    %86 = vector.extract %85[0, 0, 0] : f32 from vector<1x1x1xf32>
    %cst_42 = arith.constant 1.22070313E-4 : f32
    %87 = arith.mulf %86, %cst_42 : f32
    %88 = vector.broadcast %87 : f32 to vector<32x256xf32>
    %89 = arith.subf %78, %88 : vector<32x256xf32>
    %90 = arith.mulf %89, %89 : vector<32x256xf32>
    %cst_43 = arith.constant dense<0.000000e+00> : vector<32xf32>
    %91 = vector.multi_reduction <add>, %90, %cst_43 [1] : vector<32x256xf32> to vector<32xf32>
    %92 = vector.shape_cast %91 : vector<32xf32> to vector<32x1xf32>
    %93 = vector.shape_cast %92 : vector<32x1xf32> to vector<1x32x1xf32>
    %cst_44 = arith.constant dense<0.000000e+00> : vector<1xf32>
    %94 = vector.multi_reduction <add>, %93, %cst_44 [1, 2] : vector<1x32x1xf32> to vector<1xf32>
    %95 = vector.shape_cast %94 : vector<1xf32> to vector<1x1x1xf32>
    %96 = vector.extract %95[0, 0, 0] : f32 from vector<1x1x1xf32>
    %cst_45 = arith.constant 1.22070313E-4 : f32
    %97 = arith.mulf %96, %cst_45 : f32
    %cst_46 = arith.constant 1.1920929E-7 : f32
    %98 = arith.addf %97, %cst_46 : f32
    %99 = math.rsqrt %98 : f32
    %100 = vector.broadcast %99 : f32 to vector<32x1xf32>
    %101 = arith.mulf %79, %100 : vector<32x1xf32>
    %102 = vector.broadcast %101 : vector<32x1xf32> to vector<32x256xf32>
    %103 = arith.mulf %89, %102 : vector<32x256xf32>
    %104 = vector.broadcast %80 : vector<32x1xf32> to vector<32x256xf32>
    %105 = arith.addf %103, %104 : vector<32x256xf32>
    %c0_47 = arith.constant 0 : index
    %c0_48 = arith.constant 0 : index
    %106 = vector.load %arg12[%c0_47, %c0_48] : memref<8x32xbf16, #tpu.memory_space<vmem>>, vector<8x32xbf16>
    %107 = arith.truncf %105 : vector<32x256xf32> to vector<32x256xbf16>
    %cst_49 = arith.constant dense<0.000000e+00> : vector<8x256xf32>
    %108 = tpu.matmul %106, %107, %cst_49 {dimension_numbers = #tpu.dot_dimension_numbers<[1], [0], [0], [1], [0, 0, 1, 1], [], []>} : vector<8x32xbf16>, vector<32x256xbf16>, vector<8x256xf32> -> vector<8x256xf32>
    %c0_50 = arith.constant 0 : index
    %c0_51 = arith.constant 0 : index
    %109 = vector.load %arg13[%c0_50, %c0_51] : memref<8x1xf32, #tpu.memory_space<vmem>>, vector<8x1xf32>
    %110 = vector.broadcast %109 : vector<8x1xf32> to vector<8x256xf32>
    %111 = arith.addf %108, %110 : vector<8x256xf32>
    %112 = arith.addf %111, %1 : vector<8x256xf32>
    %c0_52 = arith.constant 0 : index
    %c0_53 = arith.constant 0 : index
    %c0_54 = arith.constant 0 : index
    %113 = vector.load %arg14[%c0_52, %c0_53, %c0_54] : memref<1x8x256xf32, #tpu.memory_space<vmem>>, vector<1x8x256xf32>
    %114 = vector.shape_cast %113 : vector<1x8x256xf32> to vector<8x256xf32>
    %115 = vector.shape_cast %112 : vector<8x256xf32> to vector<1x8x256xf32>
    tpu.vector_store %arg14[%c0_52, %c0_53, %c0_54], %115 {strides = array<i32>} : memref<1x8x256xf32, #tpu.memory_space<vmem>>, vector<1x8x256xf32>,
    return
  }
  func.func @transform_0(%arg0: i32) -> (i32, i32, i32) {
    %c0_i32 = arith.constant 0 : i32
    %c0_i32_0 = arith.constant 0 : i32
    %c0_i32_1 = arith.constant 0 : i32
    return %arg0, %c0_i32, %c0_i32_0 : i32, i32, i32
  }
  func.func @transform_1(%arg0: i32) -> (i32, i32) {
    %c0_i32 = arith.constant 0 : i32
    %c0_i32_0 = arith.constant 0 : i32
    %c0_i32_1 = arith.constant 0 : i32
    return %c0_i32, %c0_i32_0 : i32, i32
  }
  func.func @transform_2(%arg0: i32) -> (i32, i32) {
    %c0_i32 = arith.constant 0 : i32
    %c0_i32_0 = arith.constant 0 : i32
    %c0_i32_1 = arith.constant 0 : i32
    return %c0_i32, %c0_i32_0 : i32, i32
  }
  func.func @transform_3(%arg0: i32) -> (i32, i32) {
    %c0_i32 = arith.constant 0 : i32
    %c0_i32_0 = arith.constant 0 : i32
    %c0_i32_1 = arith.constant 0 : i32
    return %c0_i32, %c0_i32_0 : i32, i32
  }
  func.func @transform_4(%arg0: i32) -> (i32, i32) {
    %c0_i32 = arith.constant 0 : i32
    %c0_i32_0 = arith.constant 0 : i32
    %c0_i32_1 = arith.constant 0 : i32
    return %c0_i32, %c0_i32_0 : i32, i32
  }
  func.func @transform_5(%arg0: i32) -> (i32, i32) {
    %c0_i32 = arith.constant 0 : i32
    %c0_i32_0 = arith.constant 0 : i32
    %c0_i32_1 = arith.constant 0 : i32
    return %c0_i32, %c0_i32_0 : i32, i32
  }
  func.func @transform_6(%arg0: i32) -> (i32, i32, i32) {
    %c0_i32 = arith.constant 0 : i32
    %c0_i32_0 = arith.constant 0 : i32
    %c0_i32_1 = arith.constant 0 : i32
    %c0_i32_2 = arith.constant 0 : i32
    return %c0_i32, %c0_i32_0, %c0_i32_1 : i32, i32, i32
  }
  func.func @transform_7(%arg0: i32) -> (i32, i32) {
    %c0_i32 = arith.constant 0 : i32
    %c0_i32_0 = arith.constant 0 : i32
    %c0_i32_1 = arith.constant 0 : i32
    return %c0_i32, %c0_i32_0 : i32, i32
  }
  func.func @transform_8(%arg0: i32) -> (i32, i32) {
    %c0_i32 = arith.constant 0 : i32
    %c0_i32_0 = arith.constant 0 : i32
    %c0_i32_1 = arith.constant 0 : i32
    return %c0_i32, %c0_i32_0 : i32, i32
  }
  func.func @transform_9(%arg0: i32) -> (i32, i32) {
    %c0_i32 = arith.constant 0 : i32
    %c0_i32_0 = arith.constant 0 : i32
    %c0_i32_1 = arith.constant 0 : i32
    return %c0_i32, %c0_i32_0 : i32, i32
  }
  func.func @transform_10(%arg0: i32) -> (i32, i32) {
    %c0_i32 = arith.constant 0 : i32
    %c0_i32_0 = arith.constant 0 : i32
    %c0_i32_1 = arith.constant 0 : i32
    return %c0_i32, %c0_i32_0 : i32, i32
  }
  func.func @transform_11(%arg0: i32) -> (i32, i32) {
    %c0_i32 = arith.constant 0 : i32
    %c0_i32_0 = arith.constant 0 : i32
    %c0_i32_1 = arith.constant 0 : i32
    return %c0_i32, %c0_i32_0 : i32, i32
  }
  func.func @transform_12(%arg0: i32) -> (i32, i32) {
    %c0_i32 = arith.constant 0 : i32
    %c0_i32_0 = arith.constant 0 : i32
    %c0_i32_1 = arith.constant 0 : i32
    return %c0_i32, %c0_i32_0 : i32, i32
  }
  func.func @transform_13(%arg0: i32) -> (i32, i32, i32) {
    %c0_i32 = arith.constant 0 : i32
    %c0_i32_0 = arith.constant 0 : i32
    %c0_i32_1 = arith.constant 0 : i32
    return %arg0, %c0_i32, %c0_i32_0 : i32, i32, i32
  }
}

</mosaic_0001>

<bundles_post_ra>
// kernel: tpu_custom_call.1
= control target key start
LH: loop header
LB: loop body
LE: loop exit
PB: predicated region body
PF: predicated region fallthrough
CT: control target
= control target key end

     0   :  { %s1944_s0 = inlined_call_operand.vmem [shape: f32[2,8,256], index: 0, kind: input, shape index: {}]   ;;  %s1945_s1 = inlined_call_operand.vmem [shape: bf16[32,8], index: 1, kind: input, shape index: {}]   ;;  %s1946_s2 = inlined_call_operand.vmem [shape: f32[32,1], index: 2, kind: input, shape index: {}]   ;;  %s1947_s3 = inlined_call_operand.<no memory space> [shape: f32[1,1], index: 3, kind: input, shape index: {}]   ;;  %s1948_s4 = inlined_call_operand.vmem [shape: f32[32,1], index: 4, kind: input, shape index: {}]   ;;  %s1949_s5 = inlined_call_operand.vmem [shape: f32[32,1], index: 5, kind: input, shape index: {}]   ;;  %s1950_s6 = inlined_call_operand.vmem [shape: f32[3,32,1], index: 6, kind: input, shape index: {}]   ;;  %s1951_s7 = inlined_call_operand.vmem [shape: f32[32,1], index: 7, kind: input, shape index: {}]   ;;  %s1952_s8 = inlined_call_operand.<no memory space> [shape: f32[1,1], index: 8, kind: input, shape index: {}]   ;;  %s1953_s9 = inlined_call_operand.vmem [shape: f32[32,1], index: 9, kind: input, shape index: {}]   ;;  %s1954_s10 = inlined_call_operand.vmem [shape: f32[32,1], index: 10, kind: input, shape index: {}]   ;;  %s1955_s11 = inlined_call_operand.vmem [shape: bf16[8,32], index: 11, kind: input, shape index: {}]   ;;  %s1956_s12 = inlined_call_operand.vmem [shape: f32[8,1], index: 12, kind: input, shape index: {}]   ;;  %s1957_s13 = inlined_call_operand.hbm [shape: f32[2,8,256], index: 13, kind: output, shape index: {}]  }
   0x1   :  { %18 = sst [smem:[#allocation2]] %s1947_s3 }
   0x2   :  { %19 = sst [smem:[#allocation3]] %s1952_s8 }
   0x3   :  { %20 = vsyncpa [#allocation5], 0 }
   0x4   :  { %22 = vsyncpa [#allocation5 + $0x1], 0  ;;  %s1497_s29 = smov 0   ;;  %s1499_s30 = smov 0  }
   0x5   :  { %s1501_s14 = smov 0   ;;  %s1503_s15 = smov 0  }
   0x6 LB: > { %s1518_s3 = sadd.s32 4294967295, %s1415_s15   ;;  %s1261_s8 = sadd.s32 4294967294, %s1415_s15   ;;  %s1415_s15 = sphi %s1503_s15, %s1965_s15   ;;  %s1411_s14 = sphi %s1501_s14, %s1964_s14   ;;  %s1407_s30 = sphi %s1499_s30, %s1963_s30   ;;  %s1403_s29 = sphi %s1497_s29, %s1962_s29  }
   0x7   : > { %s1522_s16 = sadd.s32 1, %s1415_s15   ;;  %s313_s17 = sadd.s32 1, %s1411_s14 }
   0x8   : > { %s310_s18 = ssub.s32 %s1415_s15, %s1522_s16  ;;  %p323_p0 = scmp.ne.s32.totalorder %s1411_s14, %s1407_s30 }
   0x9   : > { %p311_p1 = scmp.eq.s32.totalorder %s310_s18, 0  ;;  %p324_p2 = scmp.eq.s32.totalorder %s1518_s3, 1 }
   0xa   : > { %p329_p3 = scmp.ne.s32.totalorder %s1407_s30, %s1403_s29  ;;  %p330_p4 = scmp.eq.s32.totalorder %s1261_s8, 1 }
   0xb   : > { %s1533_s19 = scalar_select %p311_p1, %s1411_s14, %s313_s17  }
   0xc   : > { %p1535_p5 = por %p324_p2, %p323_p0  ;;  %p1539_p6 = por %p330_p4, %p329_p3 }
   0xd   : > { %1958 = sst [smem:[#allocation7_spill]] %s1533_s19  ;;  %p1264_p7 = scmp.ge.s32.totalorder %s1415_s15, 1 }
   0xe   : > { %p392_p8 = scmp.lt.s32.totalorder %s1415_s15, 3 }
  0x10   : > { %p393_p9 = pnand %p1264_p7, %p392_p8 }
  0x11   : > { %p436_p10 = scmp.lt.s32.totalorder (!%p393_p9), %s1518_s3, 1  ;;  %v1417_v0 = vmov (!%p393_p9), 0   ;;  %v450_v1 = vld [vmem:[%s1946_s2] sm:$0xff] (!%p393_p9)  ;;  %v452_v2 = vld [vmem:[%s1946_s2 + $0x10] sm:$0xff] (!%p393_p9)  ;;  %v451_v3 = vld [vmem:[%s1946_s2 + $0x8] sm:$0xff] (!%p393_p9)  ;;  %vm491_vm0 = vcmask (!%p393_p9), 1043456  }
  0x12   : > { %396 = sbr.rel (%p393_p9) target bundleno = 2496 (0x9c0), region = 72  ;;  %530 = vmatprep.mubr.bf16.mxu0 (!%p393_p9), %v1417_v0  ;;  %1343 = vset.pattern.permute.xlu0 (!%p393_p9), %v1417_v0  ;;  %v453_v4 = vld [vmem:[%s1946_s2 + $0x18] sm:$0xff] (!%p393_p9)  ;;  %v1345_v10 = vld [vmem:[%s1945_s1] sm:$0xff] (!%p393_p9)   ;;  %vm484_vm1 = vcmask (!%p393_p9), 64512   ;;  %v1346_v11 = vld [vmem:[%s1945_s1 + $0x8] sm:$0xff] (!%p393_p9)   ;;  %s551_s28 = sld [smem:[#allocation2]] (!%p393_p9) }
  0x13   : > { %1344 = vset.pattern.permute.xlu1 (!%p393_p9), %v1417_v0  ;;  %1174 = vmatprep.mubr.bf16.mxu1 (!%p393_p9), %v1417_v0  ;;  %vm597_vm10 = vcmask (!%p393_p9), 7168   ;;  %s1418_s24 = smov (!%p393_p9), 2  }
  0x14   : > { %456 = vperm.xlu0 (!%p393_p9), %1343, %v450_v1   ;;  %466 = vperm.xlu1 (!%p393_p9), %1344, %v452_v2  }
  0x18   : > { %461 = vperm.xlu0 (!%p393_p9), %1343, %v451_v3   ;;  %471 = vperm.xlu1 (!%p393_p9), %1344, %v453_v4   ;;  %v560_v14 = vstv (!%p393_p9), %s551_s28 }
  0x19   : > { %s437_s22 = scalar_select %p436_p10, %s1518_s3, 1 }
  0x1b   : > { %s1287_s27 = sshll.u32 %s437_s22, 4  ;;  %s1419_s22 = smov 126  }
  0x1c   : > { %s1559_s19 = scalar_lea.vmem %s1944_s0, %s1287_s27 }
  0x1d   : > { %v443_v5 = vld [vmem:[%s1559_s19 + $0x8] sm:$0xff]  ;;  %v442_v6 = vld [vmem:[%s1559_s19] sm:$0xff] }
  0x1e   : > { %v449_v7 = vpack.c.bf16 %v443_v5, %v443_v5  ;;  %v448_v8 = vpack.c.bf16 %v442_v6, %v442_v6 }
  0x20   : > { %1270 = vmatprep.subr.msk.bf16.mxu0 %vm491_vm0, %v449_v7  ;;  %v493_v9 = vsel %vm491_vm0, %v448_v8, 0 }
  0x21   : > { %499 = vmatpush1.bf16.msra.mxu0 %v493_v9 }
  0x24   : > { %1271 = vmatmul.mubr.msk.bf16.vlgmr.msra.gmra.mrb[0].mxu0 %vm484_vm1, %v1345_v10 }
  0x25   : > { %540 = vmatprep.mubr.bf16.mxu0 %v1417_v0 }
  0x2c   : > { %1272 = vmatmul.mubr.msk.bf16.gmra.mrb[4].mxu0 %vm484_vm1, %v1346_v11 }
  0x93   : > { %v457_v12 = vpop.permute.xlu0 %456  ;;  %v467_v20 = vpop.permute.xlu1 %466 }
  0x97   : > { %v462_v15 = vpop.permute.xlu0 %461  ;;  %v472_v33 = vpop.permute.xlu1 %471 }
  0xf7   : > { %v532_v13 = vpop.f32.mrb[0].mxu0 }
  0xf8   : > { %v533_v16 = vadd.f32 %v532_v13, %v457_v12  ;;  %v534_v17 = vpop.f32.mrb[1].mxu0 }
  0xf9   : > { %v535_v18 = vadd.f32 %v534_v17, %v457_v12  ;;  %v536_v19 = vpop.f32.mrb[2].mxu0 }
  0xfa   : > { %v561_v21 = vmul.f32 %v560_v14, %v533_v16  ;;  %v537_v22 = vadd.f32 %v536_v19, %v462_v15  ;;  %v538_v23 = vpop.f32.mrb[3].mxu0  ;;  %vm552_vm2 = vcmp.ge.f32.partialorder %v533_v16, 0.0 }
  0xfb   : > { %v562_v24 = vmul.f32 %v560_v14, %v535_v18  ;;  %v539_v25 = vadd.f32 %v538_v23, %v462_v15  ;;  %vm553_vm3 = vcmp.ge.f32.partialorder %v535_v18, 0.0 }
  0xfc   : > { %v563_v26 = vmul.f32 %v560_v14, %v537_v22  ;;  %v569_v27 = vsel %vm552_vm2, %v533_v16, %v561_v21  ;;  %vm554_vm4 = vcmp.ge.f32.partialorder %v537_v22, 0.0 }
  0xfd   : > { %v564_v28 = vmul.f32 %v560_v14, %v539_v25  ;;  %v570_v29 = vsel %vm553_vm3, %v535_v18, %v562_v24  ;;  %vm555_vm5 = vcmp.ge.f32.partialorder %v539_v25, 0.0 }
  0xfe   : > { %v585_v30 = vadd.f32 %v570_v29, %v569_v27  ;;  %v571_v31 = vsel %vm554_vm4, %v537_v22, %v563_v26 }
  0xff   : > { %v542_v32 = vpop.f32.mrb[4].mxu0  ;;  %v572_v34 = vsel %vm555_vm5, %v539_v25, %v564_v28  ;;  %v581_v28 = vld [vmem:[%s1949_s5] sm:$0xff] }
 0x100   : > { %v543_v35 = vadd.f32 %v542_v32, %v467_v20  ;;  %v544_v36 = vpop.f32.mrb[5].mxu0  ;;  %586 = vadd.xlane.f32.xlu0 %v585_v30  ;;  %v588_v37 = vadd.f32 %v572_v34, %v571_v31 }
 0x101   : > { %v545_v38 = vadd.f32 %v544_v36, %v467_v20  ;;  %v546_v39 = vpop.f32.mrb[6].mxu0 }
 0x102   : > { %v565_v40 = vmul.f32 %v560_v14, %v543_v35  ;;  %v547_v41 = vadd.f32 %v546_v39, %v472_v33  ;;  %v548_v42 = vpop.f32.mrb[7].mxu0  ;;  %589 = vadd.xlane.f32.xlu1 %v588_v37  ;;  %vm556_vm6 = vcmp.ge.f32.partialorder %v543_v35, 0.0 }
 0x103   : > { %v566_v43 = vmul.f32 %v560_v14, %v545_v38  ;;  %v549_v44 = vadd.f32 %v548_v42, %v472_v33  ;;  %vm557_vm7 = vcmp.ge.f32.partialorder %v545_v38, 0.0 }
 0x104   : > { %v567_v45 = vmul.f32 %v560_v14, %v547_v41  ;;  %v573_v46 = vsel %vm556_vm6, %v543_v35, %v565_v40  ;;  %vm558_vm8 = vcmp.ge.f32.partialorder %v547_v41, 0.0  ;;  %v582_v40 = vld [vmem:[%s1949_s5 + $0x8] sm:$0xff] }
 0x105   : > { %v568_v47 = vmul.f32 %v560_v14, %v549_v44  ;;  %v574_v48 = vsel %vm557_vm7, %v545_v38, %v566_v43  ;;  %vm559_vm9 = vcmp.ge.f32.partialorder %v549_v44, 0.0  ;;  %vm1138_vm7 = vcmask 261120  }
 0x106   : > { %v591_v49 = vadd.f32 %v574_v48, %v573_v46  ;;  %v575_v50 = vsel %vm558_vm8, %v547_v41, %v567_v45 }
 0x107   : > { %v576_v51 = vsel %vm559_vm9, %v549_v44, %v568_v47 }
 0x108   : > { %592 = vadd.xlane.f32.xlu0 %v591_v49  ;;  %v594_v52 = vadd.f32 %v576_v51, %v575_v50 }
 0x10c   : > { %595 = vadd.xlane.f32.xlu0 %v594_v52 }
 0x18d   : > { %v587_v53 = vpop.xlane.xlu0 %586 }
 0x18e   : > { %v598_v57 = vsel %vm597_vm10, %v587_v53, 0.0 }
 0x18f   : > { %v590_v54 = vpop.xlane.xlu1 %589 }
 0x190   : > { %v599_v55 = vsel %vm597_vm10, %v590_v54, 0.0 }
 0x191   : > { %v600_v59 = vadd.f32 %v599_v55, %v598_v57  ;;  %v579_v55 = vld [vmem:[%s1948_s4 + $0x10] sm:$0xff] }
 0x195   : > { %v593_v56 = vpop.xlane.xlu0 %592 }
 0x196   : > { %v601_v58 = vsel %vm597_vm10, %v593_v56, 0.0  ;;  %v583_v56 = vld [vmem:[%s1949_s5 + $0x10] sm:$0xff] }
 0x197   : > { %v602_v60 = vadd.f32 %v601_v58, %v600_v59  ;;  %v580_v58 = vld [vmem:[%s1948_s4 + $0x18] sm:$0xff]  ;;  %v768_v59 = vld [vmem:[%s1950_s6] sm:$0xff] }
 0x199   : > { %v596_v61 = vpop.xlane.xlu0 %595 }
 0x19a   : > { %v603_v62 = vsel %vm597_vm10, %v596_v61, 0.0  ;;  %v770_v61 = vld [vmem:[%s1950_s6 + $0x10] sm:$0xff] }
 0x19b   : > { %v604_v63 = vadd.f32 %v603_v62, %v602_v60  ;;  %v584_v62 = vld [vmem:[%s1949_s5 + $0x18] sm:$0xff] }
 0x19d   : > { %605 = vadd.xlane.f32.xlu1 %v604_v63  ;;  %v801_v63 = vld [vmem:[%s1951_s7 + $0x8] sm:$0xff] }
 0x22a   : > { %v606_v0 = vpop.xlane.xlu1 %605 }
 0x22b   : > { %v607_v1 = vrot.slane %v606_v0, 4 }
 0x22d   : > { %v608_v2 = vadd.f32 %v607_v1, %v606_v0  ;;  %v769_v0 = vld [vmem:[%s1950_s6 + $0x8] sm:$0xff] }
 0x22e   : > { %v1274_v1 = vld [vmem:[%s1950_s6 + $0x28] sm:$0xff] }
 0x22f   : > { %v609_v3 = vrot.slane %v608_v2, 2 }
 0x231   : > { %v610_v4 = vadd.f32 %v609_v3, %v608_v2  ;;  %v800_v2 = vld [vmem:[%s1951_s7] sm:$0xff]  ;;  %v802_v3 = vld [vmem:[%s1951_s7 + $0x10] sm:$0xff] }
 0x233   : > { %v611_v5 = vrot.slane %v610_v4, 1 }
 0x235   : > { %v612_v6 = vadd.f32 %v611_v5, %v610_v4  ;;  %v1273_v4 = vld [vmem:[%s1950_s6 + $0x20] sm:$0xff] }
 0x236   : > { %v1277_v5 = vld [vmem:[%s1950_s6 + $0x40] sm:$0xff] }
 0x237   : > { %1289 = vpush %v612_v6  ;;  %v771_v6 = vld [vmem:[%s1950_s6 + $0x18] sm:$0xff] }
 0x268   : > { %s1290_s8 = spop %1289 }
 0x269   : > { %s614_s17 = smul.f32 0.00012207031, %s1290_s8 }
 0x26b   : > { %v615_v7 = vstv %s614_s17 }
 0x26c   : > { %v1576_v8 = vsub.f32 %v571_v31, %v615_v7  ;;  %v1578_v9 = vsub.f32 %v572_v34, %v615_v7  ;;  %v1580_v10 = vsub.f32 %v569_v27, %v615_v7  ;;  %v1582_v11 = vsub.f32 %v570_v29, %v615_v7 }
 0x26d   : > { %v1584_v12 = vsub.f32 %v575_v50, %v615_v7  ;;  %v1586_v13 = vsub.f32 %v576_v51, %v615_v7  ;;  %v1588_v14 = vsub.f32 %v573_v46, %v615_v7  ;;  %v1590_v15 = vsub.f32 %v574_v48, %v615_v7  ;;  %v578_v50 = vld [vmem:[%s1948_s4 + $0x8] sm:$0xff]  ;;  %v577_v51 = vld [vmem:[%s1948_s4] sm:$0xff]  ;;  %v803_v7 = vld [vmem:[%s1951_s7 + $0x18] sm:$0xff] }
 0x26e   : > { %v626_v16 = vmul.f32 %v1576_v8, %v1576_v8  ;;  %v627_v17 = vmul.f32 %v1578_v9, %v1578_v9  ;;  %v624_v18 = vmul.f32 %v1580_v10, %v1580_v10  ;;  %v625_v19 = vmul.f32 %v1582_v11, %v1582_v11 }
 0x26f   : > { %v630_v20 = vmul.f32 %v1584_v12, %v1584_v12  ;;  %v631_v21 = vmul.f32 %v1586_v13, %v1586_v13  ;;  %v628_v24 = vmul.f32 %v1588_v14, %v1588_v14  ;;  %v629_v25 = vmul.f32 %v1590_v15, %v1590_v15 }
 0x270   : > { %v635_v22 = vadd.f32 %v627_v17, %v626_v16  ;;  %v632_v23 = vadd.f32 %v625_v19, %v624_v18  ;;  %v1275_v16 = vld [vmem:[%s1950_s6 + $0x30] sm:$0xff]  ;;  %v1278_v18 = vld [vmem:[%s1950_s6 + $0x48] sm:$0xff]  ;;  %v1276_v19 = vld [vmem:[%s1950_s6 + $0x38] sm:$0xff] }
 0x271   : > { %v641_v26 = vadd.f32 %v631_v21, %v630_v20  ;;  %v638_v27 = vadd.f32 %v629_v25, %v628_v24  ;;  %v1279_v17 = vld [vmem:[%s1950_s6 + $0x50] sm:$0xff]  ;;  %v1280_v20 = vld [vmem:[%s1950_s6 + $0x58] sm:$0xff] }
 0x272   : > { %636 = vadd.xlane.f32.xlu1 %v635_v22  ;;  %633 = vadd.xlane.f32.xlu0 %v632_v23 }
 0x276   : > { %642 = vadd.xlane.f32.xlu1 %v641_v26  ;;  %639 = vadd.xlane.f32.xlu0 %v638_v27 }
 0x287   : > { %700 = vperm.xlu1 %1344, %v581_v28  }
 0x2ff   : > { %v637_v29 = vpop.xlane.xlu1 %636  ;;  %v634_v30 = vpop.xlane.xlu0 %633 }
 0x300   : > { %v645_v31 = vsel %vm597_vm10, %v637_v29, 0.0  ;;  %v644_v32 = vsel %vm597_vm10, %v634_v30, 0.0 }
 0x301   : > { %v646_v33 = vadd.f32 %v645_v31, %v644_v32 }
 0x303   : > { %v643_v34 = vpop.xlane.xlu1 %642  ;;  %v640_v35 = vpop.xlane.xlu0 %639 }
 0x304   : > { %v647_v36 = vsel %vm597_vm10, %v640_v35, 0.0  ;;  %v649_v38 = vsel %vm597_vm10, %v643_v34, 0.0 }
 0x305   : > { %v648_v37 = vadd.f32 %v647_v36, %v646_v33 }
 0x307   : > { %v650_v39 = vadd.f32 %v649_v38, %v648_v37  ;;  %v701_v21 = vpop.permute.xlu1 %700 }
 0x309   : > { %651 = vadd.xlane.f32.xlu0 %v650_v39 }
 0x31f   : > { %705 = vperm.xlu0 %1343, %v582_v40  }
 0x396   : > { %v652_v41 = vpop.xlane.xlu0 %651 }
 0x397   : > { %v653_v42 = vrot.slane %v652_v41, 4 }
 0x399   : > { %v654_v43 = vadd.f32 %v653_v42, %v652_v41 }
 0x39b   : > { %v655_v44 = vrot.slane %v654_v43, 2 }
 0x39d   : > { %v656_v45 = vadd.f32 %v655_v44, %v654_v43 }
 0x39e   : > { %v706_v22 = vpop.permute.xlu0 %705 }
 0x39f   : > { %v657_v46 = vrot.slane %v656_v45, 1 }
 0x3a1   : > { %v658_v47 = vadd.f32 %v657_v46, %v656_v45 }
 0x3a3   : > { %1291 = vpush %v658_v47 }
 0x3d4   : > { %s1292_s25 = spop %1291 }
 0x3d5   : > { %s660_s26 = smul.f32 0.00012207031, %s1292_s25  ;;  %s953_s25 = sld [smem:[#allocation3]] }
 0x3d7   : > { %s661_s27 = sadd.f32 1.1920929e-07, %s660_s26 }
 0x3d9   : > { %v662_v48 = vstv %s661_s27 }
 0x3da   : > { %1347 = vrsqrt.f32 %v662_v48 }
 0x3e4   : > { %v1348_v49 = vpop.eup %1347 }
 0x3e5   : > { %1293 = vpush %v1348_v49 }
 0x416   : > { %s1294_s23 = spop %1293 }
 0x417   : > { %v665_v52 = vstv %s1294_s23 }
 0x418   : > { %v667_v53 = vmul.f32 %v665_v52, %v578_v50  ;;  %v666_v54 = vmul.f32 %v665_v52, %v577_v51  ;;  %v668_v57 = vmul.f32 %v665_v52, %v579_v55  ;;  %v669_v60 = vmul.f32 %v665_v52, %v580_v58 }
 0x419   : > { %v726_v51 = vlaneseq }
 0x41a   : > { %677 = vperm.xlu0 %1343, %v667_v53   ;;  %672 = vperm.xlu1 %1344, %v666_v54  }
 0x41b   : > { %v1732_v54 = vand.u32 127, %v726_v51 }
 0x41d   : > { %vm745_vm11 = vcmp.lt.s32.totalorder %v1732_v54, 2  ;;  %vm754_vm12 = vcmp.ge.s32.totalorder %v1732_v54, 2  ;;  %vm889_vm13 = vcmp.lt.s32.totalorder %v1732_v54, 126 }
 0x41e   : > { %710 = vperm.xlu0 %1343, %v583_v56   ;;  %682 = vperm.xlu1 %1344, %v668_v57  }
 0x422   : > { %774 = vperm.xlu0 %1343, %v768_v59   ;;  %687 = vperm.xlu1 %1344, %v669_v60  }
 0x426   : > { %784 = vperm.xlu0 %1343, %v770_v61   ;;  %715 = vperm.xlu1 %1344, %v584_v62  }
 0x42a   : > { %811 = vperm.xlu0 %1343, %v801_v63   ;;  %779 = vperm.xlu1 %1344, %v769_v0  }
 0x42e   : > { %844 = vperm.xlu0 %1343, %v1274_v1   ;;  %806 = vperm.xlu1 %1344, %v800_v2  }
 0x432   : > { %816 = vperm.xlu0 %1343, %v802_v3   ;;  %839 = vperm.xlu1 %1344, %v1273_v4   ;;  %v1751_v4 = vadd.s32 128, %v1732_v54 }
 0x434   : > { %vm899_vm14 = vcmp.lt.s32.totalorder %v1751_v4, 254 }
 0x436   : > { %919 = vperm.xlu0 %1343, %v1277_v5   ;;  %789 = vperm.xlu1 %1344, %v771_v6  }
 0x43a   : > { %821 = vperm.xlu0 %1343, %v803_v7   ;;  %849 = vperm.xlu1 %1344, %v1275_v16  }
 0x43e   : > { %929 = vperm.xlu0 %1343, %v1279_v17   ;;  %924 = vperm.xlu1 %1344, %v1278_v18  }
 0x442   : > { %854 = vperm.xlu1 %1344, %v1276_v19  }
 0x446   : > { %934 = vperm.xlu1 %1344, %v1280_v20  }
 0x499   : > { %v673_v23 = vpop.permute.xlu1 %672  ;;  %v678_v24 = vpop.permute.xlu0 %677 }
 0x49a   : > { %v690_v25 = vmul.f32 %v673_v23, %v1580_v10  ;;  %v692_v26 = vmul.f32 %v678_v24, %v1576_v8  ;;  %v691_v27 = vmul.f32 %v673_v23, %v1582_v11  ;;  %v693_v29 = vmul.f32 %v678_v24, %v1578_v9 }
 0x49b   : > { %v1765_v24 = vstv %s953_s25 }
 0x49c   : > { %v1687_v28 = vadd.f32 %v701_v21, %v690_v25  ;;  %v1690_v30 = vadd.f32 %v706_v22, %v692_v26  ;;  %v1694_v32 = vadd.f32 %v701_v21, %v691_v27  ;;  %v1696_v33 = vadd.f32 %v706_v22, %v693_v29 }
 0x49d   : > { %v683_v31 = vpop.permute.xlu1 %682  ;;  %v711_v9 = vpop.permute.xlu0 %710 }
 0x49e   : > { %729 = vrot.lane.b32.xlu0 %v1687_v28, %s1418_s24  ;;  %731 = vrot.lane.b32.xlu1 %v1690_v30, %s1418_s24  ;;  %v694_v8 = vmul.f32 %v683_v31, %v1588_v14  ;;  %v695_v10 = vmul.f32 %v683_v31, %v1590_v15 }
 0x4a0   : > { %v1702_v34 = vadd.f32 %v711_v9, %v694_v8  ;;  %v1704_v35 = vadd.f32 %v711_v9, %v695_v10 }
 0x4a1   : > { %v688_v11 = vpop.permute.xlu1 %687 }
 0x4a2   : > { %737 = vrot.lane.b32.xlu0 %v1694_v32, %s1418_s24  ;;  %739 = vrot.lane.b32.xlu1 %v1696_v33, %s1418_s24  ;;  %v696_v37 = vmul.f32 %v688_v11, %v1584_v12  ;;  %v697_v38 = vmul.f32 %v688_v11, %v1586_v13  ;;  %v775_v12 = vpop.permute.xlu0 %774 }
 0x4a5   : > { %v716_v36 = vpop.permute.xlu1 %715 }
 0x4a6   : > { %741 = vrot.lane.b32.xlu0 %v1704_v35, %s1418_s24  ;;  %733 = vrot.lane.b32.xlu1 %v1702_v34, %s1418_s24  ;;  %v1710_v14 = vadd.f32 %v716_v36, %v696_v37  ;;  %v1712_v15 = vadd.f32 %v716_v36, %v697_v38  ;;  %v785_v39 = vpop.permute.xlu0 %784 }
 0x4a9   : > { %v780_v13 = vpop.permute.xlu1 %779 }
 0x4aa   : > { %735 = vrot.lane.b32.xlu0 %v1710_v14, %s1418_s24  ;;  %743 = vrot.lane.b32.xlu1 %v1712_v15, %s1418_s24  ;;  %v812_v41 = vpop.permute.xlu0 %811 }
 0x4ad   : > { %v807_v40 = vpop.permute.xlu1 %806 }
 0x4ae   : > { %873 = vrot.lane.b32.xlu0 %v1687_v28, %s1419_s22  ;;  %875 = vrot.lane.b32.xlu1 %v1690_v30, %s1419_s22  ;;  %v845_v43 = vpop.permute.xlu0 %844 }
 0x4af   : > { %v859_v37 = vmul.f32 %v845_v43, %v1690_v30  ;;  %v860_v38 = vmul.f32 %v845_v43, %v1696_v33 }
 0x4b1   : > { %v840_v42 = vpop.permute.xlu1 %839 }
 0x4b2   : > { %881 = vrot.lane.b32.xlu0 %v1694_v32, %s1419_s22  ;;  %883 = vrot.lane.b32.xlu1 %v1696_v33, %s1419_s22  ;;  %v817_v45 = vpop.permute.xlu0 %816 }
 0x4b5   : > { %v790_v44 = vpop.permute.xlu1 %789 }
 0x4b6   : > { %877 = vrot.lane.b32.xlu0 %v1702_v34, %s1419_s22  ;;  %885 = vrot.lane.b32.xlu1 %v1704_v35, %s1419_s22  ;;  %v1724_v47 = vpop.permute.xlu0 %919 }
 0x4b9   : > { %v850_v46 = vpop.permute.xlu1 %849 }
 0x4ba   : > { %879 = vrot.lane.b32.xlu0 %v1710_v14, %s1419_s22  ;;  %887 = vrot.lane.b32.xlu1 %v1712_v15, %s1419_s22  ;;  %v822_v49 = vpop.permute.xlu0 %821  ;;  %v861_v51 = vmul.f32 %v850_v46, %v1702_v34 }
 0x4bd   : > { %v1726_v48 = vpop.permute.xlu1 %924 }
 0x4be   : > { %v1728_v52 = vpop.permute.xlu0 %929 }
 0x4c1   : > { %v855_v50 = vpop.permute.xlu1 %854 }
 0x4c5   : > { %v1730_v53 = vpop.permute.xlu1 %934 }
 0x510   : > { %v732_v55 = vpop.permute.xlu1 %731  ;;  %v730_v56 = vpop.permute.xlu0 %729 }
 0x514   : > { %v740_v57 = vpop.permute.xlu1 %739  ;;  %v738_v58 = vpop.permute.xlu0 %737 }
 0x515   : > { %v751_v59 = vsel %vm745_vm11, %v740_v57, %v732_v55  ;;  %v750_v60 = vsel %vm745_vm11, %v738_v58, %v730_v56  ;;  %v747_v61 = vsel %vm745_vm11, %v732_v55, %v740_v57  ;;  %v746_v62 = vsel %vm745_vm11, %v730_v56, %v738_v58 }
 0x516   : > { %v762_v1 = vsel %vm754_vm12, %v751_v59, 0.0  ;;  %v760_v2 = vsel %vm754_vm12, %v750_v60, 0.0  ;;  %v795_v5 = vmul.f32 %v780_v13, %v747_v61  ;;  %v793_v6 = vmul.f32 %v775_v12, %v746_v62 }
 0x517   : > { %v794_v7 = vmul.f32 %v780_v13, %v762_v1  ;;  %v792_v16 = vmul.f32 %v775_v12, %v760_v2  ;;  %v857_v12 = vmul.f32 %v840_v42, %v1687_v28  ;;  %v858_v13 = vmul.f32 %v840_v42, %v1694_v32 }
 0x518   : > { %v734_v63 = vpop.permute.xlu1 %733  ;;  %v742_v0 = vpop.permute.xlu0 %741  ;;  %v827_v25 = vadd.f32 %v812_v41, %v795_v5  ;;  %v825_v26 = vadd.f32 %v807_v40, %v793_v6  ;;  %v862_v55 = vmul.f32 %v850_v46, %v1704_v35 }
 0x519   : > { %v752_v3 = vsel %vm745_vm11, %v742_v0, %v734_v63  ;;  %v748_v17 = vsel %vm745_vm11, %v734_v63, %v742_v0  ;;  %v826_v31 = vadd.f32 %v812_v41, %v794_v7  ;;  %v824_v8 = vadd.f32 %v807_v40, %v792_v16 }
 0x51a   : > { %v764_v18 = vsel %vm754_vm12, %v752_v3, 0.0  ;;  %v797_v29 = vmul.f32 %v785_v39, %v748_v17  ;;  %v864_v40 = vmul.f32 %v855_v50, %v1712_v15  ;;  %v868_v41 = vadd.f32 %v860_v38, %v827_v25 }
 0x51b   : > { %v796_v27 = vmul.f32 %v785_v39, %v764_v18  ;;  %v863_v39 = vmul.f32 %v855_v50, %v1710_v14  ;;  %v867_v33 = vadd.f32 %v859_v37, %v826_v31  ;;  %v865_v43 = vadd.f32 %v857_v12, %v824_v8 }
 0x51c   : > { %v744_v19 = vpop.permute.xlu1 %743  ;;  %v736_v20 = vpop.permute.xlu0 %735  ;;  %v829_v57 = vadd.f32 %v817_v45, %v797_v29 }
 0x51d   : > { %v749_v21 = vsel %vm745_vm11, %v736_v20, %v744_v19  ;;  %v753_v22 = vsel %vm745_vm11, %v744_v19, %v736_v20  ;;  %v828_v56 = vadd.f32 %v817_v45, %v796_v27 }
 0x51e   : > { %v766_v23 = vsel %vm754_vm12, %v753_v22, 0.0  ;;  %v799_v11 = vmul.f32 %v790_v44, %v749_v21 }
 0x51f   : > { %v798_v10 = vmul.f32 %v790_v44, %v766_v23  ;;  %v866_v44 = vadd.f32 %v858_v13, %v825_v26  ;;  %v869_v61 = vadd.f32 %v861_v51, %v828_v56 }
 0x520   : > { %v876_v9 = vpop.permute.xlu1 %875  ;;  %v874_v36 = vpop.permute.xlu0 %873  ;;  %v831_v30 = vadd.f32 %v822_v49, %v799_v11 }
 0x521   : > { %v830_v58 = vadd.f32 %v822_v49, %v798_v10  ;;  %v870_v49 = vadd.f32 %v862_v55, %v829_v57 }
 0x522   : > { %v872_v62 = vadd.f32 %v864_v40, %v831_v30 }
 0x523   : > { %v871_v3 = vadd.f32 %v863_v39, %v830_v58 }
 0x524   : > { %v884_v59 = vpop.permute.xlu1 %883  ;;  %v882_v28 = vpop.permute.xlu0 %881 }
 0x525   : > { %v891_v32 = vsel %vm889_vm13, %v876_v9, %v884_v59  ;;  %v895_v34 = vsel %vm889_vm13, %v884_v59, %v876_v9  ;;  %v890_v35 = vsel %vm889_vm13, %v874_v36, %v882_v28  ;;  %v894_v14 = vsel %vm889_vm13, %v882_v28, %v874_v36 }
 0x526   : > { %v907_v15 = vsel %vm899_vm14, %v895_v34, 0.0  ;;  %v939_v42 = vmul.f32 %v1726_v48, %v891_v32  ;;  %v905_v45 = vsel %vm899_vm14, %v894_v14, 0.0  ;;  %v937_v46 = vmul.f32 %v1724_v47, %v890_v35 }
 0x527   : > { %v940_v50 = vmul.f32 %v1726_v48, %v907_v15  ;;  %v938_v60 = vmul.f32 %v1724_v47, %v905_v45 }
 0x528   : > { %v947_v63 = vadd.f32 %v939_v42, %v867_v33  ;;  %v945_v0 = vadd.f32 %v937_v46, %v865_v43  ;;  %v886_v1 = vpop.permute.xlu1 %885  ;;  %v878_v2 = vpop.permute.xlu0 %877 }
 0x529   : > { %v948_v5 = vadd.f32 %v940_v50, %v868_v41  ;;  %v946_v6 = vadd.f32 %v938_v60, %v866_v44  ;;  %v892_v7 = vsel %vm889_vm13, %v878_v2, %v886_v1  ;;  %v896_v16 = vsel %vm889_vm13, %v886_v1, %v878_v2 }
 0x52a   : > { %v909_v48 = vsel %vm899_vm14, %v896_v16, 0.0  ;;  %v941_v47 = vmul.f32 %v1728_v52, %v892_v7  ;;  %vm956_vm15 = vcmp.ge.f32.partialorder %v947_v63, 0.0  ;;  %v965_v17 = vmul.f32 %v1765_v24, %v947_v63 }
 0x52b   : > { %v942_v18 = vmul.f32 %v1728_v52, %v909_v48  ;;  %vm957_vm0 = vcmp.ge.f32.partialorder %v948_v5, 0.0  ;;  %v966_v19 = vmul.f32 %v1765_v24, %v948_v5  ;;  %vm954_vm1 = vcmp.ge.f32.partialorder %v945_v0, 0.0 }
 0x52c   : > { %v949_v20 = vadd.f32 %v941_v47, %v869_v61  ;;  %v888_v21 = vpop.permute.xlu1 %887  ;;  %v880_v22 = vpop.permute.xlu0 %879  ;;  %v973_v23 = vsel %vm956_vm15, %v947_v63, %v965_v17  ;;  %vm955_vm2 = vcmp.ge.f32.partialorder %v946_v6, 0.0  ;;  %v963_v25 = vmul.f32 %v1765_v24, %v945_v0 }
 0x52d   : > { %v950_v26 = vadd.f32 %v942_v18, %v870_v49  ;;  %v893_v27 = vsel %vm889_vm13, %v880_v22, %v888_v21  ;;  %v897_v29 = vsel %vm889_vm13, %v888_v21, %v880_v22  ;;  %v974_v31 = vsel %vm957_vm0, %v948_v5, %v966_v19 }
 0x52e   : > { %v911_v52 = vsel %vm899_vm14, %v897_v29, 0.0  ;;  %v943_v8 = vmul.f32 %v1730_v53, %v893_v27  ;;  %v990_v10 = vadd.f32 %v974_v31, %v973_v23  ;;  %v964_v11 = vmul.f32 %v1765_v24, %v946_v6 }
 0x52f   : > { %v944_v9 = vmul.f32 %v1730_v53, %v911_v52  ;;  %v971_v36 = vsel %vm954_vm1, %v945_v0, %v963_v25  ;;  %vm958_vm3 = vcmp.ge.f32.partialorder %v949_v20, 0.0  ;;  %vm959_vm4 = vcmp.ge.f32.partialorder %v950_v26, 0.0  ;;  %v983_v25 = vld [vmem:[%s1954_s10] sm:$0xff] }
 0x530   : > { %v951_v37 = vadd.f32 %v943_v8, %v871_v3  ;;  %991 = vadd.xlane.f32.xlu1 %v990_v10  ;;  %v972_v54 = vsel %vm955_vm2, %v946_v6, %v964_v11  ;;  %v967_v38 = vmul.f32 %v1765_v24, %v949_v20  ;;  %v968_v4 = vmul.f32 %v1765_v24, %v950_v26 }
 0x531   : > { %v952_v12 = vadd.f32 %v944_v9, %v872_v62  ;;  %v987_v13 = vadd.f32 %v972_v54, %v971_v36 }
 0x532   : > { %v975_v51 = vsel %vm958_vm3, %v949_v20, %v967_v38  ;;  %v976_v55 = vsel %vm959_vm4, %v950_v26, %v968_v4  ;;  %vm960_vm5 = vcmp.ge.f32.partialorder %v951_v37, 0.0  ;;  %v969_v39 = vmul.f32 %v1765_v24, %v951_v37  ;;  %v984_v26 = vld [vmem:[%s1954_s10 + $0x8] sm:$0xff] }
 0x533   : > { %988 = vadd.xlane.f32.xlu0 %v987_v13  ;;  %v993_v53 = vadd.f32 %v976_v55, %v975_v51  ;;  %vm961_vm6 = vcmp.ge.f32.partialorder %v952_v12, 0.0  ;;  %v970_v40 = vmul.f32 %v1765_v24, %v952_v12 }
 0x534   : > { %v977_v41 = vsel %vm960_vm5, %v951_v37, %v969_v39 }
 0x535   : > { %v978_v44 = vsel %vm961_vm6, %v952_v12, %v970_v40 }
 0x536   : > { %v996_v56 = vadd.f32 %v978_v44, %v977_v41 }
 0x537   : > { %994 = vadd.xlane.f32.xlu0 %v993_v53 }
 0x53b   : > { %997 = vadd.xlane.f32.xlu0 %v996_v56 }
 0x5bd   : > { %v992_v57 = vpop.xlane.xlu1 %991 }
 0x5be   : > { %v1000_v30 = vsel %vm597_vm10, %v992_v57, 0.0 }
 0x5c0   : > { %v989_v58 = vpop.xlane.xlu0 %988 }
 0x5c1   : > { %v999_v59 = vsel %vm597_vm10, %v989_v58, 0.0 }
 0x5c2   : > { %v1001_v28 = vadd.f32 %v1000_v30, %v999_v59  ;;  %v981_v30 = vld [vmem:[%s1953_s9 + $0x10] sm:$0xff]  ;;  %v982_v59 = vld [vmem:[%s1953_s9 + $0x18] sm:$0xff] }
 0x5c4   : > { %v995_v33 = vpop.xlane.xlu0 %994 }
 0x5c5   : > { %v1002_v43 = vsel %vm597_vm10, %v995_v33, 0.0 }
 0x5c6   : > { %v1003_v32 = vadd.f32 %v1002_v43, %v1001_v28  ;;  %v985_v28 = vld [vmem:[%s1954_s10 + $0x10] sm:$0xff] }
 0x5c8   : > { %v998_v34 = vpop.xlane.xlu0 %997 }
 0x5c9   : > { %v1004_v35 = vsel %vm597_vm10, %v998_v34, 0.0  ;;  %v1132_v34 = vld [vmem:[%s1956_s12] sm:$0xff] }
 0x5ca   : > { %v1005_v24 = vadd.f32 %v1004_v35, %v1003_v32  ;;  %v986_v32 = vld [vmem:[%s1954_s10 + $0x18] sm:$0xff] }
 0x5cc   : > { %1006 = vadd.xlane.f32.xlu1 %v1005_v24 }
 0x659   : > { %v1007_v14 = vpop.xlane.xlu1 %1006 }
 0x65a   : > { %v1008_v15 = vrot.slane %v1007_v14, 4 }
 0x65c   : > { %v1009_v42 = vadd.f32 %v1008_v15, %v1007_v14 }
 0x65e   : > { %v1010_v45 = vrot.slane %v1009_v42, 2 }
 0x660   : > { %v1011_v46 = vadd.f32 %v1010_v45, %v1009_v42 }
 0x662   : > { %v1012_v49 = vrot.slane %v1011_v46, 1 }
 0x664   : > { %v1013_v50 = vadd.f32 %v1012_v49, %v1011_v46 }
 0x666   : > { %1295 = vpush %v1013_v50 }
 0x697   : > { %s1296_s26 = spop %1295 }
 0x698   : > { %s1015_s27 = smul.f32 0.00012207031, %s1296_s26 }
 0x69a   : > { %v1016_v60 = vstv %s1015_s27 }
 0x69b   : > { %v1821_v61 = vsub.f32 %v973_v23, %v1016_v60  ;;  %v1823_v62 = vsub.f32 %v974_v31, %v1016_v60  ;;  %v1825_v63 = vsub.f32 %v971_v36, %v1016_v60  ;;  %v1827_v0 = vsub.f32 %v972_v54, %v1016_v60 }
 0x69c   : > { %v1829_v1 = vsub.f32 %v977_v41, %v1016_v60  ;;  %v1831_v2 = vsub.f32 %v978_v44, %v1016_v60  ;;  %v1833_v3 = vsub.f32 %v975_v51, %v1016_v60  ;;  %v1835_v5 = vsub.f32 %v976_v55, %v1016_v60  ;;  %v979_v41 = vld [vmem:[%s1953_s9] sm:$0xff]  ;;  %v980_v44 = vld [vmem:[%s1953_s9 + $0x8] sm:$0xff] }
 0x69d   : > { %v1027_v6 = vmul.f32 %v1821_v61, %v1821_v61  ;;  %v1028_v7 = vmul.f32 %v1823_v62, %v1823_v62  ;;  %v1025_v16 = vmul.f32 %v1825_v63, %v1825_v63  ;;  %v1026_v48 = vmul.f32 %v1827_v0, %v1827_v0 }
 0x69e   : > { %v1031_v47 = vmul.f32 %v1829_v1, %v1829_v1  ;;  %v1032_v17 = vmul.f32 %v1831_v2, %v1831_v2  ;;  %v1029_v20 = vmul.f32 %v1833_v3, %v1833_v3  ;;  %v1030_v21 = vmul.f32 %v1835_v5, %v1835_v5 }
 0x69f   : > { %v1036_v18 = vadd.f32 %v1028_v7, %v1027_v6  ;;  %v1033_v19 = vadd.f32 %v1026_v48, %v1025_v16 }
 0x6a0   : > { %v1042_v22 = vadd.f32 %v1032_v17, %v1031_v47  ;;  %v1039_v23 = vadd.f32 %v1030_v21, %v1029_v20 }
 0x6a1   : > { %1037 = vadd.xlane.f32.xlu1 %v1036_v18  ;;  %1034 = vadd.xlane.f32.xlu0 %v1033_v19 }
 0x6a5   : > { %1043 = vadd.xlane.f32.xlu1 %v1042_v22  ;;  %1040 = vadd.xlane.f32.xlu0 %v1039_v23 }
 0x6b6   : > { %1101 = vperm.xlu1 %1344, %v983_v25  }
 0x6ba   : > { %1106 = vperm.xlu1 %1344, %v984_v26  }
 0x72e   : > { %v1038_v27 = vpop.xlane.xlu1 %1037  ;;  %v1035_v29 = vpop.xlane.xlu0 %1034 }
 0x72f   : > { %v1046_v31 = vsel %vm597_vm10, %v1038_v27, 0.0  ;;  %v1045_v52 = vsel %vm597_vm10, %v1035_v29, 0.0 }
 0x730   : > { %v1047_v8 = vadd.f32 %v1046_v31, %v1045_v52  ;;  %v1351_v52 = vld [vmem:[%s1559_s19] sm:$0xff] }
 0x732   : > { %v1044_v10 = vpop.xlane.xlu1 %1043  ;;  %v1041_v11 = vpop.xlane.xlu0 %1040 }
 0x733   : > { %v1048_v9 = vsel %vm597_vm10, %v1041_v11, 0.0  ;;  %v1050_v37 = vsel %vm597_vm10, %v1044_v10, 0.0  ;;  %v1352_v11 = vld [vmem:[%s1559_s19 + $0x8] sm:$0xff]  ;;  %s1420_s19 = smov [#allocation4]  }
 0x734   : > { %v1049_v36 = vadd.f32 %v1048_v9, %v1047_v8  ;;  %s1357_s18 = sshll.u32 %s1420_s19, 4  ;;  %s1358_s18 = int_to_ptr.vmem [resolvable:$false] %s1357_s18 }
 0x736   : > { %v1051_v54 = vadd.f32 %v1050_v37, %v1049_v36  ;;  %v1102_v35 = vpop.permute.xlu1 %1101 }
 0x738   : > { %1052 = vadd.xlane.f32.xlu0 %v1051_v54 }
 0x73a   : > { %v1107_v24 = vpop.permute.xlu1 %1106 }
 0x7c5   : > { %v1053_v38 = vpop.xlane.xlu0 %1052 }
 0x7c6   : > { %v1054_v4 = vrot.slane %v1053_v38, 4 }
 0x7c8   : > { %v1055_v12 = vadd.f32 %v1054_v4, %v1053_v38 }
 0x7ca   : > { %v1056_v13 = vrot.slane %v1055_v12, 2 }
 0x7cc   : > { %v1057_v51 = vadd.f32 %v1056_v13, %v1055_v12 }
 0x7ce   : > { %v1058_v55 = vrot.slane %v1057_v51, 1 }
 0x7d0   : > { %v1059_v39 = vadd.f32 %v1058_v55, %v1057_v51 }
 0x7d2   : > { %1297 = vpush %v1059_v39 }
 0x803   : > { %s1298_s23 = spop %1297 }
 0x804   : > { %s1061_s24 = smul.f32 0.00012207031, %s1298_s23  ;;  %s433_s23 = sand.u32 1, %s1407_s30  }
 0x806   : > { %s1062_s22 = sadd.f32 1.1920929e-07, %s1061_s24  ;;  %s1265_s24 = sshll.u32 %s433_s23, 4 }
 0x807   : > { %s435_s25 = scalar_lea.vmem [#allocation4], %s1265_s24  ;;  %s1359_s24 = scalar_lea.vmem %s1358_s18, 512 }
 0x808   : > { %v1063_v53 = vstv %s1062_s22  ;;  %s1288_s22 = sshll.u32 %s1518_s3, 8  ;;  %s1202_s26 = sshll.u32 %s435_s25, 4  ;;  %s1904_s26 = int_to_ptr.vmem [resolvable:$true] %s1202_s26 }
 0x809   : > { %1349 = vrsqrt.f32 %v1063_v53  ;;  %s1188_s3 = scalar_lea.sflag [#allocation5], %s433_s23  ;;  %s1353_s17 = scalar_lea.vmem %s1904_s26, 256 }
 0x80a   : > { %p1354_p11 = scmp.ne.s32.totalorder %s1904_s26, %s1353_s17  ;;  %p1360_p0 = scmp.lt.s32.totalorder %s1904_s26, %s1358_s18 }
 0x80b   : > { %p1361_p1 = scmp.lt.s32.totalorder %s1359_s24, %s1353_s17 }
 0x80c   : > { %p1355_p12 = pnand %p1354_p11, %p1535_p5 }
 0x80d   : > { %p1362_p2 = por %p1361_p1, %p1360_p0 }
 0x80e   : > { %p1356_p13 = pneg %p1355_p12 }
 0x810   : > { %p1363_p3 = pnand %p1362_p2, %p1356_p13 }
 0x813   : > { %v1350_v40 = vpop.eup %1349 }
 0x814   : > { %1299 = vpush %v1350_v40 }
 0x845   : > { %s1300_s8 = spop %1299 }
 0x846   : > { %v1066_v56 = vstv %s1300_s8  ;;  %s1902_s8 = scalar_lea.hbm %s1957_s13, %s1288_s22 }
 0x847   : > { %v1067_v57 = vmul.f32 %v1066_v56, %v979_v41  ;;  %v1068_v58 = vmul.f32 %v1066_v56, %v980_v44  ;;  %v1069_v33 = vmul.f32 %v1066_v56, %v981_v30  ;;  %v1070_v43 = vmul.f32 %v1066_v56, %v982_v59 }
 0x849   : > { %1078 = vperm.xlu0 %1343, %v1068_v58   ;;  %1073 = vperm.xlu1 %1344, %v1067_v57  }
 0x84d   : > { %1083 = vperm.xlu0 %1343, %v1069_v33   ;;  %1088 = vperm.xlu1 %1344, %v1070_v43  }
 0x851   : > { %1111 = vperm.xlu0 %1343, %v985_v28   ;;  %1116 = vperm.xlu1 %1344, %v986_v32  }
 0x855   : > { %1135 = vperm.xlu0 %1343, %v1132_v34  }
 0x8c8   : > { %v1079_v14 = vpop.permute.xlu0 %1078  ;;  %v1074_v15 = vpop.permute.xlu1 %1073 }
 0x8c9   : > { %v1093_v42 = vmul.f32 %v1079_v14, %v1821_v61  ;;  %v1094_v45 = vmul.f32 %v1079_v14, %v1823_v62  ;;  %v1091_v46 = vmul.f32 %v1074_v15, %v1825_v63  ;;  %v1092_v49 = vmul.f32 %v1074_v15, %v1827_v0 }
 0x8cb   : > { %v1120_v50 = vadd.f32 %v1102_v35, %v1092_v49  ;;  %v1122_v60 = vadd.f32 %v1107_v24, %v1094_v45  ;;  %v1119_v6 = vadd.f32 %v1102_v35, %v1091_v46  ;;  %v1121_v7 = vadd.f32 %v1107_v24, %v1093_v42 }
 0x8cc   : > { %v1084_v16 = vpop.permute.xlu0 %1083  ;;  %v1089_v48 = vpop.permute.xlu1 %1088 }
 0x8cd   : > { %v1129_v47 = vpack.c.bf16 %v1122_v60, %v1120_v50  ;;  %v1128_v17 = vpack.c.bf16 %v1121_v7, %v1119_v6  ;;  %v1095_v18 = vmul.f32 %v1084_v16, %v1833_v3  ;;  %v1096_v19 = vmul.f32 %v1084_v16, %v1835_v5 }
 0x8ce   : > { %v1097_v61 = vmul.f32 %v1089_v48, %v1829_v1  ;;  %v1098_v62 = vmul.f32 %v1089_v48, %v1831_v2  ;;  %v1127_v1 = vld [vmem:[%s1955_s11] sm:$0xf] }
 0x8cf   : > { %1142 = vmatprep.subr.bf16.mxu1 %v1129_v47 }
 0x8d0   : > { %v1112_v63 = vpop.permute.xlu0 %1111  ;;  %v1117_v0 = vpop.permute.xlu1 %1116  ;;  %1143 = vmatpush1.bf16.msra.mxu1 %v1128_v17 }
 0x8d1   : > { %v1123_v20 = vadd.f32 %v1112_v63, %v1095_v18  ;;  %v1124_v21 = vadd.f32 %v1112_v63, %v1096_v19  ;;  %v1125_v22 = vadd.f32 %v1117_v0, %v1097_v61  ;;  %v1126_v23 = vadd.f32 %v1117_v0, %v1098_v62 }
 0x8d3   : > { %v1130_v25 = vpack.c.bf16 %v1125_v22, %v1123_v20  ;;  %v1131_v26 = vpack.c.bf16 %v1126_v23, %v1124_v21 }
 0x8d4   : > { %v1136_v2 = vpop.permute.xlu0 %1135 }
 0x8d5   : > { %1144 = vmatprep.subr.bf16.mxu1 %v1131_v26 }
 0x8d6   : > { %1145 = vmatpush1.bf16.msra.mxu1 %v1130_v25 }
 0x8d9   : > { %1281 = vmatmul.mubr.msk.bf16.vlgmr.msra.gmra.mrb[0].mxu1 %vm1138_vm7, %v1127_v1 }
 0x9ac   : > { %v1176_v3 = vpop.f32.mrb[0].mxu1 }
 0x9ad   : > { %v1177_v5 = vadd.f32 %v1176_v3, %v1136_v2  ;;  %v1178_v27 = vpop.f32.mrb[1].mxu1 }
 0x9ae   : > { %v1179_v29 = vadd.f32 %v1178_v27, %v1136_v2  ;;  %v1180_v31 = vpop.f32.mrb[2].mxu1 }
 0x9af   : > { %v1183_v8 = vadd.f32 %v1351_v52, %v1177_v5  ;;  %v1181_v10 = vpop.f32.mrb[3].mxu1 }
 0x9b0   : > { %v1184_v9 = vadd.f32 %v1352_v11, %v1179_v29 }
 0x9b1   : > { %1185 = vst [vmem:[%s435_s25] sm:$0xff] %v1183_v8 }
 0x9b2   : > { %1186 = vst [vmem:[%s435_s25 + $0x8] sm:$0xff] %v1184_v9 }
 0x9b3   : > { %1366 = shalt.err (!%p1363_p3)
}
 0x9b4   : > { %s1367_s23 = scalar_lea.hbm %s1902_s8, 256  ;;  %s1371_s27 = scalar_lea.hbm %s1957_s13, 512 }
 0x9b5   : > { %p1368_p4 = scmp.ne.s32.totalorder %s1902_s8, %s1367_s23  ;;  %p1372_p9 = scmp.lt.u32.totalorder %s1902_s8, %s1957_s13 }
 0x9b6   : > { %p1373_p10 = scmp.lt.u32.totalorder %s1371_s27, %s1367_s23  ;;  %p1375_p12 = scmp.lt.u32.totalorder %s1367_s23, %s1902_s8 }
 0x9b7   : > { %p1369_p7 = pnand %p1368_p4, %p1535_p5 }
 0x9b8   : > { %p1374_p11 = por %p1373_p10, %p1372_p9 }
 0x9b9   : > { %p1370_p8 = pneg %p1369_p7 }
 0x9ba   : > { %p1376_p13 = por %p1375_p12, %p1374_p11 }
 0x9bc   : > { %p1377_p0 = pnand %p1376_p13, %p1370_p8 }
 0x9be   : > { %1380 = shalt.err (!%p1377_p0)
}
 0x9bf   : > { %1301 = dma.vmem_to_hbm [thread:$0]  (%p1535_p5), %s1904_s26, 256, %s1902_s8, %s1188_s3  }
 0x9c0 PF: > { %p1307_p1 = scmp.ge.s32.totalorder %s1415_s15, 2  ;;  %s1214_s17 = sand.u32 1, %s1403_s29  }
 0x9c1   : > { %s1215_s18 = scalar_lea.sflag [#allocation5], %s1214_s17 }
 0x9c2   : > { %p1304_p2 = pnand %p1307_p1, %p1539_p6 }
 0x9c4   : > { %1398 = dma.done.wait (!%p1304_p2), %s1215_s18, 256  }
 0x9c5   : > { %1400 = vsyncadd (!%p1304_p2), %s1215_s18, 4294967040  ;;  %s1961_s24 = sld [smem:[#allocation7_spill]]  ;;  %p25_p3 = scmp.ge.s32.totalorder %s1522_s16, 4  }
 0x9c6   : > { %s1962_s29 = smov %s1407_s30  ;;  %s1963_s30 = smov %s1411_s14 }
 0x9c7   : > { %s1965_s15 = smov %s1522_s16  ;;  %27 = sbr.rel (!%p25_p3) target bundleno = 6 (0x6), region = 109 }
 0x9cb   : > { %s1964_s14 = smov %s1961_s24 }
 0x9ce   :  { %1220 = vsyncpa [#allocation5], 1 }
 0x9cf   :  { %1222 = vsyncpa [#allocation5 + $0x1], 1 }

</bundles_post_ra>
